<compile_context>
chip_gen: v6e
topology: v6e:2x2x1
jax: 0.10.0
libtpu: 0.0.40
codegen_flags: <defaults>
</compile_context>

<pallas_src>
import jax
import jax.numpy as jnp
from jax.experimental import pallas as pl
from jax.experimental.pallas import tpu as pltpu

NUM_INPUTS = 784
NUM_OUTPUTS = 10
DEFAULT_TB = 1024      # batch tile (rows per grid step)


def _round_up(x, m):
    return ((x + m - 1) // m) * m


def linear_kernel(x_ref, wt_ref, b_ref, o_ref):
    # x_ref:  (TB, 784)  VMEM, bf16 — one batch tile (auto-pipelined)
    # wt_ref: (784, 10)  VMEM, bf16 — W^T, resident (constant index map)
    # b_ref:  (1, 10)    VMEM, f32  — bias, resident
    # o_ref:  (TB, 10)   VMEM, f32  — output tile (boundary block masked)
    y = jnp.dot(x_ref[...], wt_ref[...], preferred_element_type=jnp.float32)
    o_ref[...] = (y + b_ref[...]).astype(o_ref.dtype)


def prepare_params(weight, bias):
    """One-time param prep: transpose + bf16-cast weight, keep bias in f32.

    weight: (10, 784) float32, bias: (10,) float32
    returns wt (784, 10) bf16, b (1, 10) f32
    """
    wt = weight.T.astype(jnp.bfloat16)                       # (784, 10)
    b = bias.astype(jnp.float32).reshape(1, NUM_OUTPUTS)     # (1, 10)
    return wt, b


def linear_net_forward(x, wt, b, *, tb=DEFAULT_TB):
    """x: (B, C, H, W) with C*H*W == 784; wt: (784, 10) bf16; b: (1, 10) f32."""
    batch = x.shape[0]
    # Flatten + bf16 cast (fuses upstream in XLA; halves the kernel's HBM read).
    x_flat = x.reshape(batch, -1).astype(jnp.bfloat16)       # (B, 784) bf16

    # Tile size: multiple of 8 sublanes; capped at ~batch/2 so the batch grid
    # has >=2 steps for v7x's two TensorCores (neutral on v5e/v6e).
    tb = min(tb, max(8, _round_up(pl.cdiv(batch, 2), 8)))
    grid = (pl.cdiv(batch, tb),)

    out = pl.pallas_call(
        linear_kernel,
        out_shape=jax.ShapeDtypeStruct((batch, NUM_OUTPUTS), jnp.float32),
        grid_spec=pl.GridSpec(
            grid=grid,
            in_specs=[
                # Activation: tiled along batch, auto-pipelined, boundary-masked.
                pl.BlockSpec((tb, NUM_INPUTS), lambda i: (i, 0)),
                # Weight / bias: constant index map -> fetched once, resident.
                pl.BlockSpec((NUM_INPUTS, NUM_OUTPUTS), lambda i: (0, 0)),
                pl.BlockSpec((1, NUM_OUTPUTS), lambda i: (0, 0)),
            ],
            out_specs=pl.BlockSpec((tb, NUM_OUTPUTS), lambda i: (i, 0)),
        ),
        compiler_params=pltpu.CompilerParams(
            dimension_semantics=("parallel",),   # no reduction axis; megacore-shardable
        ),
    )(x_flat, wt, b)

    return out


def init_params(key):
    """Deterministic init mirroring nn.Linear's default U(-1/sqrt(in), 1/sqrt(in))."""
    kw, kb = jax.random.split(key)
    bound = 1.0 / jnp.sqrt(jnp.float32(NUM_INPUTS))
    weight = jax.random.uniform(
        kw, (NUM_OUTPUTS, NUM_INPUTS), dtype=jnp.float32, minval=-bound, maxval=bound
    )
    bias = jax.random.uniform(
        kb, (NUM_OUTPUTS,), dtype=jnp.float32, minval=-bound, maxval=bound
    )
    return weight, bias


if __name__ == "__main__":
    key = jax.random.PRNGKey(0)
    k_x, k_p = jax.random.split(key)

    batch = 4
    # MNIST-style input implied by num_inputs=784: (B, 1, 28, 28), NCHW
    x = jax.random.normal(k_x, (batch, 1, 28, 28), dtype=jnp.float32)
    weight, bias = init_params(k_p)

    # One-time parameter preparation (transpose + bf16 cast), not per call.
    wt, b = prepare_params(weight, bias)

    y = linear_net_forward(x, wt, b)
    y = jax.block_until_ready(y)

    # Sanity check vs plain-JAX f32 reference of the PyTorch module semantics.
    # Tolerance loosened for the bf16 activation/weight path (f32 accumulate).
    y_ref = x.reshape(batch, -1) @ weight.T + bias
    assert y.shape == (batch, NUM_OUTPUTS)
    assert jnp.allclose(y, y_ref, atol=2e-2, rtol=2e-2)

    print("KERNEL_OK")
</pallas_src>

<mosaic_0001>
module attributes {stable_mosaic.version = 11 : i64} {
  func.func @linear_kernel(%arg0: i32, %arg1: memref<8x784xbf16, #tpu.memory_space<vmem>>, %arg2: memref<784x10xbf16, #tpu.memory_space<vmem>>, %arg3: memref<1x10xf32, #tpu.memory_space<vmem>>, %arg4: memref<8x10xf32, #tpu.memory_space<vmem>>) attributes {dimension_semantics = [#tpu.dimension_semantics<parallel>], iteration_bounds = array<i64: 1>, scalar_prefetch = 0 : i64, scratch_operands = 0 : i64, tpu.core_type = #tpu.core_type<tc>, window_params = [{transform_indices = @transform_0, window_bounds = array<i64: 8, 784>}, {pipeline_mode = #tpu.pipeline_mode<synchronous>, transform_indices = @transform_1, window_bounds = array<i64: 784, 10>}, {pipeline_mode = #tpu.pipeline_mode<synchronous>, transform_indices = @transform_2, window_bounds = array<i64: 1, 10>}, {transform_indices = @transform_3, window_bounds = array<i64: 8, 10>}]} {
    %c0 = arith.constant 0 : index
    %c0_0 = arith.constant 0 : index
    %0 = vector.load %arg1[%c0, %c0_0] : memref<8x784xbf16, #tpu.memory_space<vmem>>, vector<8x784xbf16>
    %c0_1 = arith.constant 0 : index
    %c0_2 = arith.constant 0 : index
    %1 = vector.load %arg2[%c0_1, %c0_2] : memref<784x10xbf16, #tpu.memory_space<vmem>>, vector<784x10xbf16>
    %cst = arith.constant dense<0.000000e+00> : vector<8x10xf32>
    %2 = tpu.matmul %0, %1, %cst {dimension_numbers = #tpu.dot_dimension_numbers<[1], [0], [0], [1], [0, 0, 1, 1], [], []>} : vector<8x784xbf16>, vector<784x10xbf16>, vector<8x10xf32> -> vector<8x10xf32>
    %c0_3 = arith.constant 0 : index
    %c0_4 = arith.constant 0 : index
    %3 = vector.load %arg3[%c0_3, %c0_4] : memref<1x10xf32, #tpu.memory_space<vmem>>, vector<1x10xf32>
    %4 = vector.broadcast %3 : vector<1x10xf32> to vector<8x10xf32>
    %5 = arith.addf %2, %4 : vector<8x10xf32>
    %c0_5 = arith.constant 0 : index
    %c0_6 = arith.constant 0 : index
    %6 = vector.load %arg4[%c0_5, %c0_6] : memref<8x10xf32, #tpu.memory_space<vmem>>, vector<8x10xf32>
    tpu.vector_store %arg4[%c0_5, %c0_6], %5 {strides = array<i32>} : memref<8x10xf32, #tpu.memory_space<vmem>>, vector<8x10xf32>,
    return
  }
  func.func @transform_0(%arg0: i32) -> (i32, i32) {
    %c0_i32 = arith.constant 0 : i32
    %c0_i32_0 = arith.constant 0 : i32
    return %arg0, %c0_i32 : i32, i32
  }
  func.func @transform_1(%arg0: i32) -> (i32, i32) {
    %c0_i32 = arith.constant 0 : i32
    %c0_i32_0 = arith.constant 0 : i32
    %c0_i32_1 = arith.constant 0 : i32
    return %c0_i32, %c0_i32_0 : i32, i32
  }
  func.func @transform_2(%arg0: i32) -> (i32, i32) {
    %c0_i32 = arith.constant 0 : i32
    %c0_i32_0 = arith.constant 0 : i32
    %c0_i32_1 = arith.constant 0 : i32
    return %c0_i32, %c0_i32_0 : i32, i32
  }
  func.func @transform_3(%arg0: i32) -> (i32, i32) {
    %c0_i32 = arith.constant 0 : i32
    %c0_i32_0 = arith.constant 0 : i32
    return %arg0, %c0_i32 : i32, i32
  }
}

</mosaic_0001>

<bundles_post_ra>
// kernel: tpu_custom_call.1
= control target key start
LH: loop header
LB: loop body
LE: loop exit
PB: predicated region body
PF: predicated region fallthrough
CT: control target
= control target key end

     0   :  { %8 = vsyncpa [#allocation3], 0  ;;  %v134_v27 = vlaneseq  ;;  %v854_v34 = vmov 1983009808   ;;  %v855_v41 = vmov 0.0   ;;  %vm856_vm0 = vmmov 0   ;;  %s1045_s0 = inlined_call_operand.vmem [shape: bf16[4,784], index: 0, kind: input, shape index: {}]   ;;  %s1046_s1 = inlined_call_operand.vmem [shape: bf16[784,10], index: 1, kind: input, shape index: {}]   ;;  %s1047_s2 = inlined_call_operand.vmem [shape: f32[1,10], index: 2, kind: input, shape index: {}]   ;;  %s1048_s3 = inlined_call_operand.hbm [shape: f32[4,10], index: 3, kind: output, shape index: {}]  }
   0x1   :  { %v777_v0 = vld [vmem:[%s1046_s1 + $0x78] sm:$0xff]   ;;  %v781_v4 = vld [vmem:[%s1046_s1 + $0x70] sm:$0xff]   ;;  %v785_v8 = vld [vmem:[%s1046_s1 + $0x68] sm:$0xff]   ;;  %v132_v35 = vunpack.c.l.s4 %v854_v34  ;;  %vm464_vm1 = vcmask 130048   ;;  %vm628_vm2 = vcmask 80896  }
   0x2   :  { %v778_v1 = vld [vmem:[%s1046_s1 + $0x38] sm:$0xff]   ;;  %697 = vmatprep.subr.bf16.mxu0 %v777_v0  ;;  %v782_v5 = vld [vmem:[%s1046_s1 + $0x30] sm:$0xff]   ;;  %v786_v9 = vld [vmem:[%s1046_s1 + $0x28] sm:$0xff]   ;;  %v135_v32 = vshrl.u32 %v134_v27, 7 }
   0x3   :  { %v779_v2 = vld [vmem:[%s1046_s1 + $0xf8] sm:$0xff]   ;;  %698 = vmatpush3.bf16.msra.mxu0 %v778_v1  ;;  %v783_v6 = vld [vmem:[%s1046_s1 + $0xf0] sm:$0xff]   ;;  %v787_v10 = vld [vmem:[%s1046_s1 + $0xe8] sm:$0xff]   ;;  %v133_v37 = vunpack.c.0.s8 %v132_v35 }
   0x4   :  { %v780_v3 = vld [vmem:[%s1046_s1 + $0xb8] sm:$0xff]   ;;  %719 = vmatprep.subr.bf16.mxu1 %v779_v2  ;;  %699 = vmatprep.subr.bf16.mxu0 %v781_v4  ;;  %v784_v7 = vld [vmem:[%s1046_s1 + $0xb0] sm:$0xff]   ;;  %v788_v11 = vld [vmem:[%s1046_s1 + $0xa8] sm:$0xff]  }
   0x5   :  { %720 = vmatpush3.bf16.msra.mxu1 %v780_v3  ;;  %v789_v12 = vld [vmem:[%s1046_s1 + $0x60] sm:$0xff]   ;;  %v793_v16 = vld [vmem:[%s1046_s1 + $0x58] sm:$0xff]   ;;  %v797_v20 = vld [vmem:[%s1046_s1 + $0x50] sm:$0xff]   ;;  %v136_v40 = vsub.s32 %v133_v37, %v135_v32 }
   0x6   :  { %721 = vmatprep.subr.bf16.mxu1 %v783_v6  ;;  %v790_v13 = vld [vmem:[%s1046_s1 + $0x20] sm:$0xff]   ;;  %v794_v17 = vld [vmem:[%s1046_s1 + $0x18] sm:$0xff]   ;;  %v798_v21 = vld [vmem:[%s1046_s1 + $0x10] sm:$0xff]  }
   0x7   :  { %700 = vmatpush3.bf16.msra.mxu0 %v782_v5  ;;  %v791_v14 = vld [vmem:[%s1046_s1 + $0xe0] sm:$0xff]   ;;  %v795_v18 = vld [vmem:[%s1046_s1 + $0xd8] sm:$0xff]   ;;  %v799_v22 = vld [vmem:[%s1046_s1 + $0xd0] sm:$0xff]  }
   0x8   :  { %701 = vmatprep.subr.bf16.mxu0 %v785_v8  ;;  %v792_v15 = vld [vmem:[%s1046_s1 + $0xa0] sm:$0xff]   ;;  %v796_v19 = vld [vmem:[%s1046_s1 + $0x98] sm:$0xff]   ;;  %v800_v23 = vld [vmem:[%s1046_s1 + $0x90] sm:$0xff]  }
   0x9   :  { %722 = vmatpush3.bf16.msra.mxu1 %v784_v7  ;;  %v801_v24 = vld [vmem:[%s1046_s1 + $0x48] sm:$0xff]   ;;  %v805_v29 = vld [vmem:[%s1046_s1 + $0x40] sm:$0xff]   ;;  %v811_v38 = vld [vmem:[%s1046_s1 + $0x178] sm:$0xff]  }
   0xa   :  { %723 = vmatprep.subr.bf16.mxu1 %v787_v10  ;;  %v802_v25 = vld [vmem:[%s1046_s1 + $0x8] sm:$0xff]   ;;  %v806_v30 = vld [vmem:[%s1046_s1] sm:$0xff]   ;;  %v813_v46 = vld [vmem:[%s1046_s1 + $0x138] sm:$0xff]  }
   0xb   :  { %702 = vmatpush3.bf16.msra.mxu0 %v786_v9  ;;  %v803_v26 = vld [vmem:[%s1046_s1 + $0xc8] sm:$0xff]   ;;  %v807_v31 = vld [vmem:[%s1046_s1 + $0xc0] sm:$0xff]   ;;  %v814_v47 = vld [vmem:[%s1046_s1 + $0x170] sm:$0xff]  }
   0xc   :  { %703 = vmatprep.subr.bf16.mxu0 %v789_v12  ;;  %v804_v28 = vld [vmem:[%s1046_s1 + $0x88] sm:$0xff]   ;;  %v810_v36 = vld [vmem:[%s1046_s1 + $0x80] sm:$0xff]   ;;  %v815_v48 = vld [vmem:[%s1046_s1 + $0x130] sm:$0xff]  }
   0xd   :  { %724 = vmatpush3.bf16.msra.mxu1 %v788_v11  ;;  %v808_v33 = vld [vmem:[%s1045_s0] ss:$14 sps:$4 sm:$0xff]   ;;  %v812_v39 = vld [vmem:[%s1045_s0 + $0x4] ss:$14 sps:$4 sm:$0xff]   ;;  %v831_v55 = vld [vmem:[%s1045_s0 + $0x8] ss:$14 sps:$4 sm:$0xff]  }
   0xe   :  { %725 = vmatprep.subr.bf16.mxu1 %v791_v14  ;;  %v137_v42 = vrot.slane %v808_v33, %v136_v40  ;;  %v144_v43 = vrot.slane %v812_v39, %v136_v40  ;;  %v816_v49 = vld [vmem:[%s1046_s1 + $0x168] sm:$0xff]   ;;  %v826_v51 = vld [vmem:[%s1046_s1 + $0x180] sm:$0xff]   ;;  %v820_v56 = vld [vmem:[%s1046_s1 + $0x158] sm:$0xff]   ;;  %v155_v58 = vrot.slane %v831_v55, %v136_v40 }
   0xf   :  { %704 = vmatpush3.bf16.msra.mxu0 %v790_v13  ;;  %v817_v50 = vld [vmem:[%s1046_s1 + $0x128] sm:$0xff]   ;;  %v818_v52 = vld [vmem:[%s1046_s1 + $0x160] sm:$0xff]   ;;  %v821_v59 = vld [vmem:[%s1046_s1 + $0x118] sm:$0xff]  }
  0x10   :  { %705 = vmatprep.subr.bf16.mxu0 %v793_v16  ;;  %v145_v44 = vcombine.high %v137_v42, %v137_v42  ;;  %v146_v45 = vcombine.high %v144_v43, %v144_v43  ;;  %v829_v53 = vld [vmem:[%s1045_s0 + $0xc] ss:$14 sps:$4 sm:$0x33]   ;;  %v819_v54 = vld [vmem:[%s1046_s1 + $0x120] sm:$0xff]   ;;  %v163_v60 = vcombine.high %v155_v58, %v155_v58  ;;  %v822_v61 = vld [vmem:[%s1046_s1 + $0x150] sm:$0xff]  }
  0x11   :  { %726 = vmatpush3.bf16.msra.mxu1 %v792_v15  ;;  %v162_v57 = vrot.slane %v829_v53, %v136_v40  ;;  %v823_v62 = vld [vmem:[%s1046_s1 + $0x110] sm:$0xff]   ;;  %v824_v63 = vld [vmem:[%s1046_s1 + $0x148] sm:$0xff]   ;;  %v827_v1 = vld [vmem:[%s1046_s1 + $0x140] sm:$0xff]  }
  0x12   :  { %727 = vmatprep.subr.bf16.mxu1 %v795_v18  ;;  %500 = vmatprep.mubr.bf16.mxu0 %v145_v44  ;;  %v825_v0 = vld [vmem:[%s1046_s1 + $0x108] sm:$0xff]   ;;  %v828_v2 = vld [vmem:[%s1046_s1 + $0x100] sm:$0xff]  }
  0x13   :  { %706 = vmatpush3.bf16.msra.mxu0 %v794_v17  ;;  %540 = vmatprep.mubr.bf16.mxu1 %v146_v45  ;;  %v646_v16 = vld [vmem:[%s1047_s2] ss:$0 sm:$0xff] }
  0x14   :  { %707 = vmatprep.subr.bf16.mxu0 %v797_v20 }
  0x15   :  { %728 = vmatpush3.bf16.msra.mxu1 %v796_v19 }
  0x16   :  { %729 = vmatprep.subr.bf16.mxu1 %v799_v22 }
  0x17   :  { %708 = vmatpush3.bf16.msra.mxu0 %v798_v21 }
  0x18   :  { %709 = vmatprep.subr.bf16.mxu0 %v801_v24 }
  0x19   :  { %730 = vmatpush3.bf16.msra.mxu1 %v800_v23 }
  0x1a   :  { %731 = vmatprep.subr.bf16.mxu1 %v803_v26 }
  0x1b   :  { %710 = vmatpush3.bf16.msra.mxu0 %v802_v25 }
  0x1c   :  { %711 = vmatprep.subr.bf16.mxu0 %v805_v29 }
  0x1d   :  { %732 = vmatpush3.bf16.msra.mxu1 %v804_v28 }
  0x1e   :  { %733 = vmatprep.subr.bf16.mxu1 %v807_v31 }
  0x1f   :  { %712 = vmatpush3.bf16.msra.mxu0 %v806_v30 }
  0x20   :  { %741 = vmatprep.subr.bf16.mxu0 %v811_v38 }
  0x21   :  { %734 = vmatpush3.bf16.msra.mxu1 %v810_v36 }
  0x22   :  { %765 = vmatprep.subr.bf16.mxu1 %v855_v41  ;;  %501 = vmatmul.mubr.bf16.vlgmr.msra.gmra.mxu0 %v137_v42 }
  0x23   :  { %742 = vmatpush3.bf16.msra.mxu0 %v813_v46  ;;  %580 = vmatprep.mubr.bf16.mxu0 %v163_v60 }
  0x24   :  { %541 = vmatmul.mubr.bf16.vlgmr.msra.gmra.mxu1 %v144_v43  ;;  %743 = vmatprep.subr.bf16.mxu0 %v814_v47 }
  0x25   :  { %767 = vmatprep.mubr.msk.bf16.mxu1 %vm856_vm0, %v855_v41  ;;  %766 = vmatpush3.bf16.msra.mxu1 %v826_v51 }
  0x27   :  { %744 = vmatpush3.bf16.msra.mxu0 %v815_v48 }
  0x28   :  { %745 = vmatprep.subr.bf16.mxu0 %v816_v49 }
  0x2b   :  { %746 = vmatpush3.bf16.msra.mxu0 %v817_v50 }
  0x2c   :  { %747 = vmatprep.subr.bf16.mxu0 %v818_v52  ;;  %768 = vmatmul.mubr.msk.bf16.vlgmr.msra.gmra.mxu1 %vm464_vm1, %v162_v57 }
  0x2f   :  { %748 = vmatpush3.bf16.msra.mxu0 %v819_v54 }
  0x30   :  { %749 = vmatprep.subr.bf16.mxu0 %v820_v56 }
  0x33   :  { %750 = vmatpush3.bf16.msra.mxu0 %v821_v59 }
  0x34   :  { %751 = vmatprep.subr.bf16.mxu0 %v822_v61 }
  0x37   :  { %752 = vmatpush3.bf16.msra.mxu0 %v823_v62 }
  0x38   :  { %753 = vmatprep.subr.bf16.mxu0 %v824_v63 }
  0x3b   :  { %754 = vmatpush3.bf16.msra.mxu0 %v825_v0 }
  0x3c   :  { %755 = vmatprep.subr.bf16.mxu0 %v827_v1 }
  0x3f   :  { %756 = vmatpush3.bf16.msra.mxu0 %v828_v2 }
  0x42   :  { %581 = vmatmul.mubr.bf16.vlgmr.msra.gmra.mxu0 %v155_v58 }
  0xe2   :  { %v713_v3 = vpop.f32.mrf.mxu0 }
  0xe4   :  { %v735_v4 = vpop.f32.mrf.mxu1  ;;  %v714_v5 = vpop.f32.mrf.mxu0 }
  0xe5   :  { %v715_v15 = vadd.f32 %v714_v5, %v713_v3 }
  0xe6   :  { %v736_v6 = vpop.f32.mrf.mxu1  ;;  %v716_v7 = vpop.f32.mrf.mxu0 }
  0xe7   :  { %v503_v17 = vadd.f32 %v715_v15, %v646_v16  ;;  %v737_v18 = vadd.f32 %v736_v6, %v735_v4 }
  0xe8   :  { %v738_v8 = vpop.f32.mrf.mxu1  ;;  %v717_v9 = vpop.f32.mrf.mxu0 }
  0xe9   :  { %v543_v21 = vadd.f32 %v737_v18, %v503_v17 }
  0xea   :  { %v739_v10 = vpop.f32.mrf.mxu1 }
  0xec   :  { %v622_v11 = vpop.f32.mrf.mxu1 }
  0xee   :  { %v769_v12 = vpop.f32.mrf.mxu1 }
  0xf0   :  { %v625_v13 = vpop.f32.mrf.mxu1 }
  0xf2   :  { %v770_v14 = vpop.f32.mrf.mxu1 }
 0x102   :  { %v757_v19 = vpop.f32.mrf.mxu0 }
 0x104   :  { %v758_v20 = vpop.f32.mrf.mxu0 }
 0x105   :  { %v759_v22 = vadd.f32 %v758_v20, %v757_v19 }
 0x106   :  { %v760_v23 = vpop.f32.mrf.mxu0 }
 0x107   :  { %v583_v24 = vadd.f32 %v759_v22, %v543_v21 }
 0x108   :  { %v761_v25 = vpop.f32.mrf.mxu0 }
 0x109   :  { %v623_v26 = vadd.f32 %v622_v11, %v583_v24 }
 0x10b   :  { %629 = vst.msk [vmem:[#allocation2] sm:$0xff] %vm628_vm2, %v623_v26 }
 0x10c   :  { %634 = vsyncadd [#allocation3], 64  ;;  %s857_s1 = smov [#allocation2]  }
 0x10d   :  { %s635_s11 = sshll.u32 %s857_s1, 4  ;;  %s636_s11 = int_to_ptr.vmem [resolvable:$true] %s635_s11 }
 0x10e   :  { %s832_s12 = scalar_lea.vmem %s636_s11, 64  ;;  %s836_s13 = scalar_lea.vmem %s636_s11, 128 }
 0x10f   :  { %p833_p0 = scmp.ne.s32.totalorder %s636_s11, %s832_s12  ;;  %p837_p1 = scmp.lt.s32.totalorder %s636_s11, %s636_s11 }
 0x110   :  { %p838_p2 = scmp.lt.s32.totalorder %s836_s13, %s832_s12 }
 0x112   :  { %p839_p3 = por %p838_p2, %p837_p1 }
 0x114   :  { %p840_p4 = pnand %p839_p3, %p833_p0 }
 0x116   :  { %843 = shalt.err (!%p840_p4)
}
 0x117   :  { %s858_s2 = smov 64   ;;  %s859_s14 = smov 4  }
 0x118   :  { %641 = dma.vmem_to_hbm [thread:$0]  %s636_s11, 64, %s1048_s3, [#allocation3], %s858_s2, %s858_s2, %s859_s14  }
 0x119   :  { %852 = dma.done.wait [#allocation3], 128  }
 0x11a   :  { %853 = vsyncadd [#allocation3], 4294967168 }
 0x11b   :  { %645 = vsyncpa [#allocation3], 1 }

</bundles_post_ra>
